<compile_context>
chip_gen: v7x
topology: tpu7x:2x2x1
jax: 0.10.0
libtpu: 0.0.40
codegen_flags: <defaults>
</compile_context>

<pallas_src>
import functools

import jax
import jax.numpy as jnp
from jax.experimental import pallas as pl
from jax.experimental.pallas import tpu as pltpu


# Class-weight tables copied from the PyTorch module.
_W4 = (0.0, 1.0 / 458259, 1.0 / 455150, 1.0 / 269909)
_W9 = (0.0, 1.0 / 227021, 1.0 / 12176, 1.0 / 257733, 1.0 / 46275,
       1.0 / 212, 1.0 / 408663, 1.0 / 97716, 1.0 / 133522)


def _round_up(x, m):
    return (x + m - 1) // m * m


def _device_defaults():
    """(num_cores, max_tile_n, vmem_limit_bytes) chosen from the device kind."""
    try:
        kind = jax.devices()[0].device_kind.lower()
    except Exception:  # pragma: no cover - defensive
        kind = ""
    if "v7" in kind or "7x" in kind:
        # 2 TensorCores / 64 MiB VMEM per TC: shard the parallel axis, cap tiles.
        return 2, 128 * 1024, 48 * 1024 * 1024
    if "v6" in kind or "v5e" in kind or "v5 lite" in kind or "v5lite" in kind:
        # Single TC, 128 MiB VMEM: bigger tiles amortize per-step overhead.
        return 1, 256 * 1024, 96 * 1024 * 1024
    # Conservative fallback (v4/v5p/unknown).
    return 1, 128 * 1024, 48 * 1024 * 1024


def _pick_tile_n(n, num_cores, max_tile_n):
    per_core = pl.cdiv(n, num_cores)
    tile = max(128, (per_core // 128) * 128)   # floor so tiles don't exceed N
    return int(min(max_tile_n, tile))


def _wce_kernel(logits_ref, labels_ref, out_ref, num_acc, den_acc, *,
                weights, n_valid, tile_n, tiles_per_core, n_tiles):
    # logits_ref: (C, T) input dtype (samples on lanes), labels_ref: (1, T) int.
    o = pl.program_id(0)
    i = pl.program_id(1)

    @pl.when(i == 0)
    def _():
        num_acc[...] = jnp.zeros_like(num_acc)
        den_acc[...] = jnp.zeros_like(den_acc)

    x = logits_ref[...].astype(jnp.float32)        # (C, T) f32 in registers
    labels = labels_ref[...].astype(jnp.int32)     # (1, T)
    C, T = x.shape

    # Global column mask: drops the ragged tail of the last tile and any
    # duplicated tile created by rounding n_tiles up to a multiple of
    # num_cores (the index_map clamps those onto the last real tile).
    t_req = o * tiles_per_core + i
    t = jnp.minimum(t_req, n_tiles - 1)
    col = t * tile_n + jax.lax.broadcasted_iota(jnp.int32, (1, T), 1)
    valid = (col < n_valid) & (t_req < n_tiles)

    # Unrolled per-class max along sublanes -> pure VPU, no XLU lane-reduce.
    m = x[0:1, :]
    for c in range(1, C):
        m = jnp.maximum(m, x[c:c + 1, :])

    # Single fused pass over the C class rows: exp-sum, target-logit select and
    # class-weight select (weights are compile-time constants).  Class 0 is
    # skipped for the selects since its weight is 0 (its value is irrelevant).
    s = jnp.zeros_like(m)
    z_y = jnp.zeros_like(m)
    w_y = jnp.zeros_like(m)
    for c in range(C):
        z = x[c:c + 1, :] - m
        s = s + jnp.exp(z)
        if c > 0 and weights[c] != 0.0:
            sel = labels == c
            z_y = jnp.where(sel, z, z_y)
            w_y = jnp.where(sel, jnp.float32(weights[c]), w_y)

    # label == 0 columns keep w_y == 0; out-of-range columns are masked below
    # in BOTH terms so garbage logits (possibly inf/NaN) cannot leak through.
    nll = jnp.log(s) - z_y                          # (1, T) = -log_softmax[y]
    num_acc[...] += jnp.sum(jnp.where(valid, nll * w_y, 0.0))
    den_acc[...] += jnp.sum(jnp.where(valid, w_y, 0.0))

    @pl.when(i == pl.num_programs(1) - 1)
    def _():
        row = jax.lax.broadcasted_iota(jnp.int32, (8, 128), 0)
        num_b = jnp.broadcast_to(num_acc[...], (8, 128))
        den_b = jnp.broadcast_to(den_acc[...], (8, 128))
        out_ref[...] = jnp.where(row == 0, num_b,
                                 jnp.where(row == 1, den_b, 0.0))


def multiple_cross_entropy_loss(y_pred, y_true, reduction='mean', *,
                                class_major=False, tile_n=None, num_cores=None,
                                max_tile_n=None, vmem_limit_bytes=None):
    """Weighted CE over samples with label > 0 (MultipleCrossEntropyLoss).

    y_pred: logits, (N, C) by default (PyTorch layout) or (C, N) when
            class_major=True (the fast, copy-free layout — e.g. straight from a
            channels-first segmentation head).
    y_true: (N,) integer labels (int8 preferred at the producer).
    """
    if class_major:
        logits_cn = y_pred                       # (C, N): no extra HBM pass.
        C, N = logits_cn.shape
    else:
        # Drop-in PyTorch layout. NOTE: this pays one XLA transpose over the
        # logits; producers that can emit class-major logits should pass
        # class_major=True instead (free).
        # TODO(synk): a transpose-free (N, C) path would need an in-kernel
        # lane de-interleave that is XLU-bound on TPU, so it is not provided.
        N, C = y_pred.shape
        logits_cn = jnp.transpose(y_pred)

    # TODO(synk): the torch code selects the weight table from a *runtime*
    # check max(y_true) == 3; that only type-checks when C matches the table
    # length, so we key the selection on the static class count C instead.
    if C == 4:
        weights = _W4
    elif C == 9:
        weights = _W9
    else:
        raise ValueError(f"unsupported number of classes: {C}")

    dflt_cores, dflt_tile, dflt_vmem = _device_defaults()
    num_cores = dflt_cores if num_cores is None else num_cores
    max_tile_n = dflt_tile if max_tile_n is None else max_tile_n
    vmem_limit_bytes = dflt_vmem if vmem_limit_bytes is None else vmem_limit_bytes

    if tile_n is None:
        tile_n = _pick_tile_n(N, num_cores, max_tile_n)
    else:
        tile_n = max(128, _round_up(int(tile_n), 128))

    n_tiles = pl.cdiv(N, tile_n)
    tiles_per_core = pl.cdiv(n_tiles, num_cores)

    # Labels: keep narrow integer dtypes as-is (no extra cast pass over HBM);
    # non-integer / 64-bit labels are cast (mirrors .type(torch.LongTensor)).
    if (not jnp.issubdtype(y_true.dtype, jnp.integer)) or y_true.dtype.itemsize > 4:
        y_true = y_true.astype(jnp.int32)
    labels = y_true.reshape(1, N)

    kernel = functools.partial(_wce_kernel, weights=weights, n_valid=N,
                               tile_n=tile_n, tiles_per_core=tiles_per_core,
                               n_tiles=n_tiles)

    def tile_index(o, i):
        # Clamp over-provisioned tiles (n_tiles rounded up to num_cores) onto
        # the last real tile; the kernel masks their contribution to zero.
        return (0, jnp.minimum(o * tiles_per_core + i, n_tiles - 1))

    out = pl.pallas_call(
        kernel,
        out_shape=jax.ShapeDtypeStruct((num_cores * 8, 128), jnp.float32),
        grid_spec=pltpu.PrefetchScalarGridSpec(
            num_scalar_prefetch=0,
            grid=(num_cores, tiles_per_core),
            in_specs=[
                pl.BlockSpec((C, tile_n), tile_index),
                pl.BlockSpec((1, tile_n), tile_index),
            ],
            out_specs=pl.BlockSpec((8, 128), lambda o, i: (o, 0)),
            scratch_shapes=[pltpu.VMEM((1, 128), jnp.float32),
                            pltpu.VMEM((1, 128), jnp.float32)],
        ),
        compiler_params=pltpu.CompilerParams(
            dimension_semantics=("parallel", "arbitrary"),
            vmem_limit_bytes=vmem_limit_bytes,
        ),
    )(logits_cn, labels)

    # Per-core partials: row 0 (of each (8,128) block) = num, row 1 = den.
    num = jnp.sum(out[0::8, 0])
    den = jnp.sum(out[1::8, 0])
    if reduction == 'mean':
        return num / den   # NaN if no label>0 anywhere, matching PyTorch.
    return num             # 'sum'


def _reference(y_pred_nc, y_true, weights, reduction='mean'):
    logp = jax.nn.log_softmax(y_pred_nc.astype(jnp.float32), axis=-1)
    lab = y_true.astype(jnp.int32)
    mask = (lab > 0).astype(jnp.float32)
    picked = jnp.take_along_axis(logp, lab[:, None], axis=-1)[:, 0]
    wy = weights[lab] * mask
    num = jnp.sum(-picked * wy)
    return num / jnp.sum(wy) if reduction == 'mean' else num


if __name__ == "__main__":
    key = jax.random.PRNGKey(0)
    k1, k2, k3, k4 = jax.random.split(key, 4)

    # Fast path: class-major (C, N) logits (free layout for a channels-first
    # head), int8 labels from the producer, small forced tile / 2-way core
    # split so the multi-tile accumulation, ragged-tail mask and clamped
    # over-provisioned-tile paths are all exercised (N not a tile multiple).
    N, C = 600, 9
    logits_cn = jax.random.normal(k1, (C, N), dtype=jnp.float32)
    labels = jax.random.randint(k2, (N,), 0, C, dtype=jnp.int32).astype(jnp.int8)

    loss = multiple_cross_entropy_loss(logits_cn, labels, reduction='mean',
                                       class_major=True, tile_n=256,
                                       num_cores=2)
    loss = jax.block_until_ready(loss)
    ref = _reference(jnp.transpose(logits_cn), labels,
                     jnp.asarray(_W9, jnp.float32))
    assert jnp.allclose(loss, ref, rtol=1e-5, atol=1e-6), (loss, ref)

    # Drop-in PyTorch layout (N, C), C=4 weight table, 'sum' reduction, with
    # device-default core count / tile size (single ragged tile).
    y_pred4 = jax.random.normal(k3, (N, 4), dtype=jnp.float32)
    y_true4 = jax.random.randint(k4, (N,), 0, 4, dtype=jnp.int32)
    loss4 = multiple_cross_entropy_loss(y_pred4, y_true4, reduction='sum')
    loss4 = jax.block_until_ready(loss4)
    ref4 = _reference(y_pred4, y_true4, jnp.asarray(_W4, jnp.float32),
                      reduction='sum')
    assert jnp.allclose(loss4, ref4, rtol=1e-5, atol=1e-6), (loss4, ref4)

    print("KERNEL_OK")
</pallas_src>

<mosaic_0001>
module attributes {stable_mosaic.version = 11 : i64} {
  func.func @_wce_kernel(%arg0: i32, %arg1: i32, %arg2: memref<9x256xf32, #tpu.memory_space<vmem>>, %arg3: memref<1x256xi8, #tpu.memory_space<vmem>>, %arg4: memref<8x128xf32, #tpu.memory_space<vmem>>, %arg5: memref<1x128xf32, #tpu.memory_space<vmem>>, %arg6: memref<1x128xf32, #tpu.memory_space<vmem>>) attributes {dimension_semantics = [#tpu.dimension_semantics<parallel>, #tpu.dimension_semantics<arbitrary>], iteration_bounds = array<i64: 2, 2>, scalar_prefetch = 0 : i64, scratch_operands = 2 : i64, tpu.core_type = #tpu.core_type<tc>, window_params = [{transform_indices = @transform_0, window_bounds = array<i64: 9, 256>}, {transform_indices = @transform_1, window_bounds = array<i64: 1, 256>}, {transform_indices = @transform_2, window_bounds = array<i64: 8, 128>}]} {
    %c0_i32 = arith.constant 0 : i32
    %0 = arith.cmpi eq, %arg1, %c0_i32 : i32
    %1 = arith.extui %0 : i1 to i32
    %c0_i32_0 = arith.constant 0 : i32
    %2 = arith.cmpi ne, %1, %c0_i32_0 : i32
    scf.if %2 {
      %cst_31 = arith.constant 0.000000e+00 : f32
      %140 = vector.broadcast %cst_31 : f32 to vector<1x128xf32>
      %c0_32 = arith.constant 0 : index
      %c0_33 = arith.constant 0 : index
      %141 = vector.load %arg5[%c0_32, %c0_33] : memref<1x128xf32, #tpu.memory_space<vmem>>, vector<1x128xf32>
      tpu.vector_store %arg5[%c0_32, %c0_33], %140 {strides = array<i32>} : memref<1x128xf32, #tpu.memory_space<vmem>>, vector<1x128xf32>,
      %cst_34 = arith.constant 0.000000e+00 : f32
      %142 = vector.broadcast %cst_34 : f32 to vector<1x128xf32>
      %c0_35 = arith.constant 0 : index
      %c0_36 = arith.constant 0 : index
      %143 = vector.load %arg6[%c0_35, %c0_36] : memref<1x128xf32, #tpu.memory_space<vmem>>, vector<1x128xf32>
      tpu.vector_store %arg6[%c0_35, %c0_36], %142 {strides = array<i32>} : memref<1x128xf32, #tpu.memory_space<vmem>>, vector<1x128xf32>,
    } else {
    }
    %c0 = arith.constant 0 : index
    %c0_1 = arith.constant 0 : index
    %3 = vector.load %arg2[%c0, %c0_1] : memref<9x256xf32, #tpu.memory_space<vmem>>, vector<9x256xf32>
    %c0_2 = arith.constant 0 : index
    %c0_3 = arith.constant 0 : index
    %4 = vector.load %arg3[%c0_2, %c0_3] : memref<1x256xi8, #tpu.memory_space<vmem>>, vector<1x256xi8>
    %5 = arith.extsi %4 : vector<1x256xi8> to vector<1x256xi32>
    %c2_i32 = arith.constant 2 : i32
    %6 = arith.muli %arg0, %c2_i32 : i32
    %7 = arith.addi %6, %arg1 : i32
    %c2_i32_4 = arith.constant 2 : i32
    %8 = arith.minsi %7, %c2_i32_4 : i32
    %c256_i32 = arith.constant 256 : i32
    %9 = arith.muli %8, %c256_i32 : i32
    %10 = tpu.iota {dimensions = array<i32: 1>} : vector<1x256xi32>
    %11 = vector.broadcast %9 : i32 to vector<1x256xi32>
    %12 = arith.addi %11, %10 : vector<1x256xi32>
    %c600_i32 = arith.constant 600 : i32
    %13 = vector.broadcast %c600_i32 : i32 to vector<1x256xi32>
    %14 = arith.cmpi slt, %12, %13 : vector<1x256xi32>
    %c3_i32 = arith.constant 3 : i32
    %15 = arith.cmpi slt, %7, %c3_i32 : i32
    %16 = vector.broadcast %15 : i1 to vector<1x256xi1>
    %17 = arith.andi %14, %16 : vector<1x256xi1>
    %18 = vector.extract_strided_slice %3 {offsets = [0, 0], sizes = [1, 256], strides = [1, 1]} : vector<9x256xf32> to vector<1x256xf32>
    %19 = vector.extract_strided_slice %3 {offsets = [1, 0], sizes = [1, 256], strides = [1, 1]} : vector<9x256xf32> to vector<1x256xf32>
    %20 = arith.maximumf %18, %19 : vector<1x256xf32>
    %21 = vector.extract_strided_slice %3 {offsets = [2, 0], sizes = [1, 256], strides = [1, 1]} : vector<9x256xf32> to vector<1x256xf32>
    %22 = arith.maximumf %20, %21 : vector<1x256xf32>
    %23 = vector.extract_strided_slice %3 {offsets = [3, 0], sizes = [1, 256], strides = [1, 1]} : vector<9x256xf32> to vector<1x256xf32>
    %24 = arith.maximumf %22, %23 : vector<1x256xf32>
    %25 = vector.extract_strided_slice %3 {offsets = [4, 0], sizes = [1, 256], strides = [1, 1]} : vector<9x256xf32> to vector<1x256xf32>
    %26 = arith.maximumf %24, %25 : vector<1x256xf32>
    %27 = vector.extract_strided_slice %3 {offsets = [5, 0], sizes = [1, 256], strides = [1, 1]} : vector<9x256xf32> to vector<1x256xf32>
    %28 = arith.maximumf %26, %27 : vector<1x256xf32>
    %29 = vector.extract_strided_slice %3 {offsets = [6, 0], sizes = [1, 256], strides = [1, 1]} : vector<9x256xf32> to vector<1x256xf32>
    %30 = arith.maximumf %28, %29 : vector<1x256xf32>
    %31 = vector.extract_strided_slice %3 {offsets = [7, 0], sizes = [1, 256], strides = [1, 1]} : vector<9x256xf32> to vector<1x256xf32>
    %32 = arith.maximumf %30, %31 : vector<1x256xf32>
    %33 = vector.extract_strided_slice %3 {offsets = [8, 0], sizes = [1, 256], strides = [1, 1]} : vector<9x256xf32> to vector<1x256xf32>
    %34 = arith.maximumf %32, %33 : vector<1x256xf32>
    %cst = arith.constant 0.000000e+00 : f32
    %35 = vector.broadcast %cst : f32 to vector<1x256xf32>
    %cst_5 = arith.constant 0.000000e+00 : f32
    %36 = vector.broadcast %cst_5 : f32 to vector<1x256xf32>
    %cst_6 = arith.constant 0.000000e+00 : f32
    %37 = vector.broadcast %cst_6 : f32 to vector<1x256xf32>
    %38 = vector.extract_strided_slice %3 {offsets = [0, 0], sizes = [1, 256], strides = [1, 1]} : vector<9x256xf32> to vector<1x256xf32>
    %39 = arith.subf %38, %34 : vector<1x256xf32>
    %40 = math.exp %39 : vector<1x256xf32>
    %41 = arith.addf %35, %40 : vector<1x256xf32>
    %42 = vector.extract_strided_slice %3 {offsets = [1, 0], sizes = [1, 256], strides = [1, 1]} : vector<9x256xf32> to vector<1x256xf32>
    %43 = arith.subf %42, %34 : vector<1x256xf32>
    %44 = math.exp %43 : vector<1x256xf32>
    %45 = arith.addf %41, %44 : vector<1x256xf32>
    %c1_i32 = arith.constant 1 : i32
    %46 = vector.broadcast %c1_i32 : i32 to vector<1x256xi32>
    %47 = arith.cmpi eq, %5, %46 : vector<1x256xi32>
    %48 = arith.select %47, %43, %36 : vector<1x256xi1>, vector<1x256xf32>
    %cst_7 = arith.constant 4.40487884E-6 : f32
    %49 = vector.broadcast %cst_7 : f32 to vector<1x256xf32>
    %50 = arith.select %47, %49, %37 : vector<1x256xi1>, vector<1x256xf32>
    %51 = vector.extract_strided_slice %3 {offsets = [2, 0], sizes = [1, 256], strides = [1, 1]} : vector<9x256xf32> to vector<1x256xf32>
    %52 = arith.subf %51, %34 : vector<1x256xf32>
    %53 = math.exp %52 : vector<1x256xf32>
    %54 = arith.addf %45, %53 : vector<1x256xf32>
    %c2_i32_8 = arith.constant 2 : i32
    %55 = vector.broadcast %c2_i32_8 : i32 to vector<1x256xi32>
    %56 = arith.cmpi eq, %5, %55 : vector<1x256xi32>
    %57 = arith.select %56, %52, %48 : vector<1x256xi1>, vector<1x256xf32>
    %cst_9 = arith.constant 8.21287758E-5 : f32
    %58 = vector.broadcast %cst_9 : f32 to vector<1x256xf32>
    %59 = arith.select %56, %58, %50 : vector<1x256xi1>, vector<1x256xf32>
    %60 = vector.extract_strided_slice %3 {offsets = [3, 0], sizes = [1, 256], strides = [1, 1]} : vector<9x256xf32> to vector<1x256xf32>
    %61 = arith.subf %60, %34 : vector<1x256xf32>
    %62 = math.exp %61 : vector<1x256xf32>
    %63 = arith.addf %54, %62 : vector<1x256xf32>
    %c3_i32_10 = arith.constant 3 : i32
    %64 = vector.broadcast %c3_i32_10 : i32 to vector<1x256xi32>
    %65 = arith.cmpi eq, %5, %64 : vector<1x256xi32>
    %66 = arith.select %65, %61, %57 : vector<1x256xi1>, vector<1x256xf32>
    %cst_11 = arith.constant 3.87998443E-6 : f32
    %67 = vector.broadcast %cst_11 : f32 to vector<1x256xf32>
    %68 = arith.select %65, %67, %59 : vector<1x256xi1>, vector<1x256xf32>
    %69 = vector.extract_strided_slice %3 {offsets = [4, 0], sizes = [1, 256], strides = [1, 1]} : vector<9x256xf32> to vector<1x256xf32>
    %70 = arith.subf %69, %34 : vector<1x256xf32>
    %71 = math.exp %70 : vector<1x256xf32>
    %72 = arith.addf %63, %71 : vector<1x256xf32>
    %c4_i32 = arith.constant 4 : i32
    %73 = vector.broadcast %c4_i32 : i32 to vector<1x256xi32>
    %74 = arith.cmpi eq, %5, %73 : vector<1x256xi32>
    %75 = arith.select %74, %70, %66 : vector<1x256xi1>, vector<1x256xf32>
    %cst_12 = arith.constant 2.16099397E-5 : f32
    %76 = vector.broadcast %cst_12 : f32 to vector<1x256xf32>
    %77 = arith.select %74, %76, %68 : vector<1x256xi1>, vector<1x256xf32>
    %78 = vector.extract_strided_slice %3 {offsets = [5, 0], sizes = [1, 256], strides = [1, 1]} : vector<9x256xf32> to vector<1x256xf32>
    %79 = arith.subf %78, %34 : vector<1x256xf32>
    %80 = math.exp %79 : vector<1x256xf32>
    %81 = arith.addf %72, %80 : vector<1x256xf32>
    %c5_i32 = arith.constant 5 : i32
    %82 = vector.broadcast %c5_i32 : i32 to vector<1x256xi32>
    %83 = arith.cmpi eq, %5, %82 : vector<1x256xi32>
    %84 = arith.select %83, %79, %75 : vector<1x256xi1>, vector<1x256xf32>
    %cst_13 = arith.constant 0.0047169812 : f32
    %85 = vector.broadcast %cst_13 : f32 to vector<1x256xf32>
    %86 = arith.select %83, %85, %77 : vector<1x256xi1>, vector<1x256xf32>
    %87 = vector.extract_strided_slice %3 {offsets = [6, 0], sizes = [1, 256], strides = [1, 1]} : vector<9x256xf32> to vector<1x256xf32>
    %88 = arith.subf %87, %34 : vector<1x256xf32>
    %89 = math.exp %88 : vector<1x256xf32>
    %90 = arith.addf %81, %89 : vector<1x256xf32>
    %c6_i32 = arith.constant 6 : i32
    %91 = vector.broadcast %c6_i32 : i32 to vector<1x256xi32>
    %92 = arith.cmpi eq, %5, %91 : vector<1x256xi32>
    %93 = arith.select %92, %88, %84 : vector<1x256xi1>, vector<1x256xf32>
    %cst_14 = arith.constant 2.44700391E-6 : f32
    %94 = vector.broadcast %cst_14 : f32 to vector<1x256xf32>
    %95 = arith.select %92, %94, %86 : vector<1x256xi1>, vector<1x256xf32>
    %96 = vector.extract_strided_slice %3 {offsets = [7, 0], sizes = [1, 256], strides = [1, 1]} : vector<9x256xf32> to vector<1x256xf32>
    %97 = arith.subf %96, %34 : vector<1x256xf32>
    %98 = math.exp %97 : vector<1x256xf32>
    %99 = arith.addf %90, %98 : vector<1x256xf32>
    %c7_i32 = arith.constant 7 : i32
    %100 = vector.broadcast %c7_i32 : i32 to vector<1x256xi32>
    %101 = arith.cmpi eq, %5, %100 : vector<1x256xi32>
    %102 = arith.select %101, %97, %93 : vector<1x256xi1>, vector<1x256xf32>
    %cst_15 = arith.constant 1.0233739E-5 : f32
    %103 = vector.broadcast %cst_15 : f32 to vector<1x256xf32>
    %104 = arith.select %101, %103, %95 : vector<1x256xi1>, vector<1x256xf32>
    %105 = vector.extract_strided_slice %3 {offsets = [8, 0], sizes = [1, 256], strides = [1, 1]} : vector<9x256xf32> to vector<1x256xf32>
    %106 = arith.subf %105, %34 : vector<1x256xf32>
    %107 = math.exp %106 : vector<1x256xf32>
    %108 = arith.addf %99, %107 : vector<1x256xf32>
    %c8_i32 = arith.constant 8 : i32
    %109 = vector.broadcast %c8_i32 : i32 to vector<1x256xi32>
    %110 = arith.cmpi eq, %5, %109 : vector<1x256xi32>
    %111 = arith.select %110, %106, %102 : vector<1x256xi1>, vector<1x256xf32>
    %cst_16 = arith.constant 7.48940238E-6 : f32
    %112 = vector.broadcast %cst_16 : f32 to vector<1x256xf32>
    %113 = arith.select %110, %112, %104 : vector<1x256xi1>, vector<1x256xf32>
    %114 = math.log %108 : vector<1x256xf32>
    %115 = arith.subf %114, %111 : vector<1x256xf32>
    %c0_17 = arith.constant 0 : index
    %c0_18 = arith.constant 0 : index
    %116 = vector.load %arg5[%c0_17, %c0_18] : memref<1x128xf32, #tpu.memory_space<vmem>>, vector<1x128xf32>
    %117 = arith.mulf %115, %113 : vector<1x256xf32>
    %cst_19 = arith.constant 0.000000e+00 : f32
    %118 = vector.broadcast %cst_19 : f32 to vector<1x256xf32>
    %119 = arith.select %17, %117, %118 : vector<1x256xi1>, vector<1x256xf32>
    %120 = vector.shape_cast %119 : vector<1x256xf32> to vector<1x1x256xf32>
    %cst_20 = arith.constant dense<0.000000e+00> : vector<1xf32>
    %121 = vector.multi_reduction <add>, %120, %cst_20 [1, 2] : vector<1x1x256xf32> to vector<1xf32>
    %122 = vector.shape_cast %121 : vector<1xf32> to vector<1x1x1xf32>
    %123 = vector.extract %122[0, 0, 0] : f32 from vector<1x1x1xf32>
    %124 = vector.broadcast %123 : f32 to vector<1x128xf32>
    %125 = arith.addf %116, %124 : vector<1x128xf32>
    %c0_21 = arith.constant 0 : index
    %c0_22 = arith.constant 0 : index
    %126 = vector.load %arg5[%c0_21, %c0_22] : memref<1x128xf32, #tpu.memory_space<vmem>>, vector<1x128xf32>
    tpu.vector_store %arg5[%c0_21, %c0_22], %125 {strides = array<i32>} : memref<1x128xf32, #tpu.memory_space<vmem>>, vector<1x128xf32>,
    %c0_23 = arith.constant 0 : index
    %c0_24 = arith.constant 0 : index
    %127 = vector.load %arg6[%c0_23, %c0_24] : memref<1x128xf32, #tpu.memory_space<vmem>>, vector<1x128xf32>
    %cst_25 = arith.constant 0.000000e+00 : f32
    %128 = vector.broadcast %cst_25 : f32 to vector<1x256xf32>
    %129 = arith.select %17, %113, %128 : vector<1x256xi1>, vector<1x256xf32>
    %130 = vector.shape_cast %129 : vector<1x256xf32> to vector<1x1x256xf32>
    %cst_26 = arith.constant dense<0.000000e+00> : vector<1xf32>
    %131 = vector.multi_reduction <add>, %130, %cst_26 [1, 2] : vector<1x1x256xf32> to vector<1xf32>
    %132 = vector.shape_cast %131 : vector<1xf32> to vector<1x1x1xf32>
    %133 = vector.extract %132[0, 0, 0] : f32 from vector<1x1x1xf32>
    %134 = vector.broadcast %133 : f32 to vector<1x128xf32>
    %135 = arith.addf %127, %134 : vector<1x128xf32>
    %c0_27 = arith.constant 0 : index
    %c0_28 = arith.constant 0 : index
    %136 = vector.load %arg6[%c0_27, %c0_28] : memref<1x128xf32, #tpu.memory_space<vmem>>, vector<1x128xf32>
    tpu.vector_store %arg6[%c0_27, %c0_28], %135 {strides = array<i32>} : memref<1x128xf32, #tpu.memory_space<vmem>>, vector<1x128xf32>,
    %c1_i32_29 = arith.constant 1 : i32
    %137 = arith.cmpi eq, %arg1, %c1_i32_29 : i32
    %138 = arith.extui %137 : i1 to i32
    %c0_i32_30 = arith.constant 0 : i32
    %139 = arith.cmpi ne, %138, %c0_i32_30 : i32
    scf.if %139 {
      %140 = tpu.iota {dimensions = array<i32: 0>} : vector<8x128xi32>
      %c0_31 = arith.constant 0 : index
      %c0_32 = arith.constant 0 : index
      %141 = vector.load %arg5[%c0_31, %c0_32] : memref<1x128xf32, #tpu.memory_space<vmem>>, vector<1x128xf32>
      %142 = vector.shape_cast %141 : vector<1x128xf32> to vector<1x128xf32>
      %143 = vector.broadcast %142 : vector<1x128xf32> to vector<8x128xf32>
      %c0_33 = arith.constant 0 : index
      %c0_34 = arith.constant 0 : index
      %144 = vector.load %arg6[%c0_33, %c0_34] : memref<1x128xf32, #tpu.memory_space<vmem>>, vector<1x128xf32>
      %145 = vector.shape_cast %144 : vector<1x128xf32> to vector<1x128xf32>
      %146 = vector.broadcast %145 : vector<1x128xf32> to vector<8x128xf32>
      %c0_i32_35 = arith.constant 0 : i32
      %147 = vector.broadcast %c0_i32_35 : i32 to vector<8x128xi32>
      %148 = arith.cmpi eq, %140, %147 : vector<8x128xi32>
      %c1_i32_36 = arith.constant 1 : i32
      %149 = vector.broadcast %c1_i32_36 : i32 to vector<8x128xi32>
      %150 = arith.cmpi eq, %140, %149 : vector<8x128xi32>
      %cst_37 = arith.constant 0.000000e+00 : f32
      %151 = vector.broadcast %cst_37 : f32 to vector<8x128xf32>
      %152 = arith.select %150, %146, %151 : vector<8x128xi1>, vector<8x128xf32>
      %153 = arith.select %148, %143, %152 : vector<8x128xi1>, vector<8x128xf32>
      %c0_38 = arith.constant 0 : index
      %c0_39 = arith.constant 0 : index
      %154 = vector.load %arg4[%c0_38, %c0_39] : memref<8x128xf32, #tpu.memory_space<vmem>>, vector<8x128xf32>
      tpu.vector_store %arg4[%c0_38, %c0_39], %153 {strides = array<i32>} : memref<8x128xf32, #tpu.memory_space<vmem>>, vector<8x128xf32>,
    } else {
    }
    return
  }
  func.func @transform_0(%arg0: i32, %arg1: i32) -> (i32, i32) {
    %c2_i32 = arith.constant 2 : i32
    %0 = arith.muli %arg0, %c2_i32 : i32
    %1 = arith.addi %0, %arg1 : i32
    %c2_i32_0 = arith.constant 2 : i32
    %2 = arith.minsi %1, %c2_i32_0 : i32
    %c0_i32 = arith.constant 0 : i32
    %c0_i32_1 = arith.constant 0 : i32
    return %c0_i32, %2 : i32, i32
  }
  func.func @transform_1(%arg0: i32, %arg1: i32) -> (i32, i32) {
    %c2_i32 = arith.constant 2 : i32
    %0 = arith.muli %arg0, %c2_i32 : i32
    %1 = arith.addi %0, %arg1 : i32
    %c2_i32_0 = arith.constant 2 : i32
    %2 = arith.minsi %1, %c2_i32_0 : i32
    %c0_i32 = arith.constant 0 : i32
    %c0_i32_1 = arith.constant 0 : i32
    return %c0_i32, %2 : i32, i32
  }
  func.func @transform_2(%arg0: i32, %arg1: i32) -> (i32, i32) {
    %c0_i32 = arith.constant 0 : i32
    %c0_i32_0 = arith.constant 0 : i32
    return %arg0, %c0_i32 : i32, i32
  }
}

</mosaic_0001>

<bundles_post_ra>
// kernel: tpu_custom_call.1
= control target key start
LH: loop header
LB: loop body
LE: loop exit
PB: predicated region body
PF: predicated region fallthrough
CT: control target
= control target key end

     0   :  { %s1621_s0 = inlined_call_operand.hbm [shape: f32[9,600], index: 0, kind: input, shape index: {}]   ;;  %s1622_s1 = inlined_call_operand.hbm [shape: s8[1,600], index: 1, kind: input, shape index: {}]   ;;  %s1623_s2 = inlined_call_operand.hbm [shape: f32[16,128], index: 2, kind: output, shape index: {}]  }
   0x1   :  { %1630 = sst [smem:[#allocation18_spill]] %s1621_s0 }
   0x2   :  { %7 = vsyncpa [#allocation5], 0 }
   0x3   :  { %9 = vsyncpa [#allocation5 + $0x1], 0 }
   0x4   :  { %10 = vsyncpa [#allocation8], 0 }
   0x5   :  { %12 = vsyncpa [#allocation8 + $0x1], 0 }
   0x6   :  { %13 = vsyncpa [#allocation6], 0 }
   0x7   :  { %15 = vsyncpa [#allocation6 + $0x1], 0  ;;  %s1163_s9 = smov 0   ;;  %s1165_s10 = smov 0  }
   0x8   :  { %s1167_s11 = smov 0   ;;  %s1169_s12 = smov 0  }
   0x9   :  { %s1171_s13 = smov 0   ;;  %s1173_s14 = smov 0  }
   0xa   :  { %s1175_s15 = smov 0   ;;  %s1177_s16 = smov 0  }
   0xb   :  { %s1179_s17 = smov 0   ;;  %s1181_s18 = smov 0  }
   0xc   :  { %s1183_s19 = smov 0  }
   0xd LB: > { %1631 = sst [smem:[#allocation13_spill]] %s1131_s17  ;;  %s765_s20 = sadd.s32 4294967295, %s1139_s19   ;;  %s1139_s19 = sphi %s1183_s19, %s21_s19   ;;  %s1135_s18 = sphi %s1181_s18, %s1648_s18   ;;  %s1131_s17 = sphi %s1179_s17, %s1647_s17   ;;  %s1127_s16 = sphi %s1177_s16, %s1646_s16   ;;  %s1123_s15 = sphi %s1175_s15, %s1645_s15   ;;  %s1119_s14 = sphi %s1173_s14, %s1654_s14   ;;  %s1115_s13 = sphi %s1171_s13, %s1653_s13   ;;  %s1111_s12 = sphi %s1169_s12, %s1652_s12   ;;  %s1107_s11 = sphi %s1167_s11, %s1651_s11   ;;  %s1103_s10 = sphi %s1165_s10, %s1650_s10   ;;  %s1099_s9 = sphi %s1163_s9, %s1649_s9  }
   0xe   : > { %1632 = sst [smem:[#allocation14_spill]] %s1135_s18  ;;  %s766_s21 = sadd.s32 4294967294, %s1139_s19  }
   0xf   : > { %s30_s22 = sadd.s32 1, %s1131_s17  ;;  %s33_s23 = sadd.s32 1, %s1135_s18 }
  0x10   : > { %p31_p0 = scmp.ge.s32.totalorder %s30_s22, 2  ;;  %s767_s24 = sshll.u32 %s1135_s18, 1 }
  0x11   : > { %s38_s25 = sadd.s32 %s1131_s17, %s767_s24  ;;  %s48_s26 = sadd.s32 1, %s1119_s14 }
  0x12   : > { %s1656_s22 = smov (%p31_p0, %s30_s22), 0  ;;  %s1658_s23 = smov (!%p31_p0, %s33_s23), %s1135_s18 }
  0x13   : > { %1633 = sst [smem:[#allocation15_spill]] %s1656_s22  ;;  %p39_p1 = scmp.lt.s32.totalorder %s38_s25, 2 }
  0x14   : > { %p55_p2 = scmp.ne.s32.totalorder %s1119_s14, %s1115_s13  ;;  %p35_p3 = scmp.ge.s32.totalorder %s1658_s23, 2 }
  0x15   : > { %p56_p4 = scmp.eq.s32.totalorder %s1139_s19, 0  ;;  %s1660_s25 = smov (!%p39_p1, %s38_s25), 2 }
  0x16   : > { %s1662_s23 = smov (%p35_p3, %s1658_s23), 0  ;;  %p61_p6 = scmp.ne.s32.totalorder %s1115_s13, %s1111_s12 }
  0x17   : > { %1634 = sst [smem:[#allocation16_spill]] %s1662_s23  ;;  %p1235_p5 = por %p56_p4, %p55_p2 }
  0x18   : > { %s768_s28 = sshll.u32 %s1662_s23, 1  ;;  %p62_p7 = scmp.eq.s32.totalorder %s765_s20, 0 }
  0x19   : > { %s42_s29 = sadd.s32 %s768_s28, %s1656_s22  ;;  %s105_s30 = ssub.s32 %s1135_s18, %s1662_s23 }
  0x1a   : > { %p43_p8 = scmp.lt.s32.totalorder %s42_s29, 2  ;;  %p1247_p9 = por %p62_p7, %p61_p6 }
  0x1b   : > { %p106_p10 = scmp.eq.s32.totalorder %s105_s30, 0  ;;  %s108_s4 = sadd.s32 1, %s1107_s11 }
  0x1c   : > { %s1636_s3 = scalar_select %p1247_p9, 1, 0 }
  0x1d   : > { %s1664_s29 = smov (!%p43_p8, %s42_s29), 2  ;;  %p118_p11 = scmp.ne.s32.totalorder %s1107_s11, %s1103_s10 }
  0x1e   : > { %s1253_s5 = scalar_select %p106_p10, %s1107_s11, %s108_s4  }
  0x1f   : > { %s45_s6 = ssub.s32 %s1660_s25, %s1664_s29  ;;  %p119_p13 = scmp.eq.s32.totalorder %s765_s20, 3 }
  0x20   : > { %p46_p12 = scmp.eq.s32.totalorder %s45_s6, 0  ;;  %p124_p0 = scmp.ne.s32.totalorder %s1103_s10, %s1099_s9 }
  0x21   : > { %p125_p1 = scmp.eq.s32.totalorder %s766_s21, 3  ;;  %p1267_p2 = por %p119_p13, %p118_p11 }
  0x22   : > { %s1265_s7 = scalar_select %p46_p12, %s1119_s14, %s48_s26  }
  0x23   : > { %s1638_s8 = scalar_select %p1267_p2, 1, 0 }
  0x24   : > { %1637 = sst [smem:[#allocation17_spill]] %s1265_s7  ;;  %p1271_p3 = por %p125_p1, %p124_p0 }
  0x25   : > { %p772_p4 = scmp.ge.s32.totalorder %s1139_s19, 4 }
  0x26   : > { %s1639_s12 = scalar_select %p1271_p3, 1, 0 }
  0x27   : > { %141 = sbr.rel (%p772_p4) target bundleno = 120 (0x78), region = 16 }
  0x2e   : > { %144 = sbr.rel (!%p1235_p5) target bundleno = 86 (0x56), region = 20  ;;  %s145_s20 = sand.u32 (%p1235_p5), 1, %s1119_s14  }
  0x2f   : > { %s775_s21 = sshll.u32 (%p1235_p5), %s1660_s25, 1  ;;  %s773_s24 = sshll.u32 (%p1235_p5), %s145_s20, 5 }
  0x30   : > { %s155_s26 = ssub.s32 (%p1235_p5), 5, %s775_s21  ;;  %s1286_s30 = scalar_lea.sflag (%p1235_p5), [#allocation5], %s145_s20 }
  0x31   : > { %p156_p6 = scmp.lt.s32.totalorder (%p1235_p5), %s155_s26, 2  ;;  %s149_s4 = scalar_lea.vmem (%p1235_p5), [#allocation4], %s773_s24 }
  0x35   : > { %s1666_s26 = smov (!%p156_p6, %s155_s26), 2 }
  0x36   : > { %s1283_s28 = sshll.u32 %s1666_s26, 8 }
  0x37   : > { %s160_s29 = ssub.s32 512, %s1283_s28 }
  0x38   : > { %161 = vsyncadd %s1286_s30, %s160_s29  ;;  %p777_p7 = scmp.ne.s32.totalorder %s1283_s28, 0  ;;  %s808_s6 = sshll.u32 %s1660_s25, 8 }
  0x39   : > { %s1640_s0 = sld [smem:[#allocation18_spill]]  ;;  %s779_s20 = sshll.u32 %s1666_s26, 3 }
  0x3a   : > { %s167_s18 = sshll.u32 %s149_s4, 4  ;;  %s1297_s18 = int_to_ptr.vmem [resolvable:$true] %s167_s18 }
  0x3f   : > { %s1294_s22 = scalar_lea.hbm %s1640_s0, %s808_s6  ;;  %s961_s7 = scalar_lea.hbm %s1640_s0, 1280 }
  0x40   : > { %s957_s24 = scalar_lea.hbm %s1294_s22, %s1283_s28  ;;  %p962_p12 = scmp.lt.u32.totalorder %s1294_s22, %s1640_s0 }
  0x41   : > { %p958_p8 = scmp.ne.s32.totalorder %s1294_s22, %s957_s24  ;;  %p963_p13 = scmp.lt.u32.totalorder %s961_s7, %s957_s24 }
  0x42   : > { %p965_p1 = scmp.lt.u32.totalorder %s957_s24, %s1294_s22 }
  0x43   : > { %p959_p10 = pnand %p958_p8, %p777_p7  ;;  %p964_p0 = por %p963_p13, %p962_p12 }
  0x45   : > { %p960_p11 = pneg %p959_p10  ;;  %p966_p4 = por %p965_p1, %p964_p0 }
  0x47   : > { %p967_p6 = pnand %p966_p4, %p960_p11 }
  0x49   : > { %970 = shalt.err (!%p967_p6)
}
  0x4a   : > { %s971_s4 = scalar_lea.vmem %s1297_s18, %s1283_s28  ;;  %s1141_s17 = smov [#allocation4]  }
  0x4b   : > { %p972_p8 = scmp.ne.s32.totalorder %s1297_s18, %s971_s4  ;;  %s975_s21 = sshll.u32 %s1141_s17, 4  ;;  %s976_s21 = int_to_ptr.vmem [resolvable:$false] %s975_s21 }
  0x4c   : > { %s977_s29 = scalar_lea.vmem %s976_s21, 1024  ;;  %p978_p2 = scmp.lt.s32.totalorder %s1297_s18, %s976_s21 }
  0x4d   : > { %p973_p10 = pnand %p972_p8, %p777_p7  ;;  %p979_p12 = scmp.lt.s32.totalorder %s977_s29, %s971_s4 }
  0x4f   : > { %p974_p3 = pneg %p973_p10  ;;  %p980_p13 = por %p979_p12, %p978_p2 }
  0x51   : > { %p981_p0 = pnand %p980_p13, %p974_p3 }
  0x53   : > { %984 = shalt.err (!%p981_p0)
}
  0x54   : > { %s1142_s7 = smov 640   ;;  %s1143_s24 = smov 256  }
  0x55   : > { %173 = dma.hbm_to_vmem [thread:$0]  (%p777_p7), %s1294_s22, %s1283_s28, %s1297_s18, %s1286_s30, %s1142_s7, %s1143_s24, %s779_s20  }
  0x56 PF: > { %176 = sbr.rel (!%p1235_p5) target bundleno = 120 (0x78), region = 24  ;;  %s177_s23 = sand.u32 (%p1235_p5), 1, %s1119_s14  }
  0x57   : > { %s784_s6 = sshll.u32 (%p1235_p5), %s1660_s25, 1  ;;  %s782_s4 = sshll.u32 (%p1235_p5), %s177_s23, 1 }
  0x58   : > { %s187_s17 = ssub.s32 (%p1235_p5), 5, %s784_s6  ;;  %s1333_s0 = scalar_lea.sflag (%p1235_p5), [#allocation8], %s177_s23 }
  0x59   : > { %p188_p2 = scmp.lt.s32.totalorder (%p1235_p5), %s187_s17, 2  ;;  %s181_s18 = scalar_lea.vmem (%p1235_p5), [#allocation7], %s782_s4 }
  0x5d   : > { %s1668_s17 = smov (!%p188_p2, %s187_s17), 2 }
  0x5e   : > { %s1330_s21 = sshll.u32 %s1668_s17, 4 }
  0x5f   : > { %s192_s29 = ssub.s32 32, %s1330_s21 }
  0x60   : > { %193 = vsyncadd %s1333_s0, %s192_s29  ;;  %p786_p5 = scmp.ne.s32.totalorder %s1330_s21, 0  ;;  %s811_s22 = sshll.u32 %s1660_s25, 5 }
  0x61   : > { %s1341_s28 = scalar_lea.hbm %s1622_s1, %s811_s22  ;;  %s198_s30 = sshll.u32 %s181_s18, 4  ;;  %s199_s30 = int_to_ptr.vmem [resolvable:$true] %s198_s30 }
  0x62   : > { %s985_s20 = scalar_lea.hbm %s1341_s28, %s1330_s21  ;;  %s989_s25 = scalar_lea.hbm %s1622_s1, 80 }
  0x63   : > { %p986_p3 = scmp.ne.s32.totalorder %s1341_s28, %s985_s20  ;;  %p990_p1 = scmp.lt.u32.totalorder %s1341_s28, %s1622_s1 }
  0x64   : > { %p991_p4 = scmp.lt.u32.totalorder %s989_s25, %s985_s20  ;;  %p993_p8 = scmp.lt.u32.totalorder %s985_s20, %s1341_s28 }
  0x65   : > { %p987_p7 = pnand %p986_p3, %p786_p5 }
  0x66   : > { %p992_p6 = por %p991_p4, %p990_p1 }
  0x67   : > { %p988_p11 = pneg %p987_p7 }
  0x68   : > { %p994_p10 = por %p993_p8, %p992_p6 }
  0x6a   : > { %p995_p12 = pnand %p994_p10, %p988_p11 }
  0x6c   : > { %998 = shalt.err (!%p995_p12)
}
  0x6d   : > { %s999_s4 = scalar_lea.vmem %s199_s30, %s1330_s21  ;;  %s1144_s17 = smov [#allocation7]  }
  0x6e   : > { %p1000_p13 = scmp.ne.s32.totalorder %s199_s30, %s999_s4  ;;  %s1003_s29 = sshll.u32 %s1144_s17, 4  ;;  %s1004_s29 = int_to_ptr.vmem [resolvable:$false] %s1003_s29 }
  0x6f   : > { %s1005_s18 = scalar_lea.vmem %s1004_s29, 64  ;;  %p1006_p3 = scmp.lt.s32.totalorder %s199_s30, %s1004_s29 }
  0x70   : > { %p1001_p0 = pnand %p1000_p13, %p786_p5  ;;  %p1007_p7 = scmp.lt.s32.totalorder %s1005_s18, %s999_s4 }
  0x72   : > { %p1002_p2 = pneg %p1001_p0  ;;  %p1008_p9 = por %p1007_p7, %p1006_p3 }
  0x74   : > { %p1009_p1 = pnand %p1008_p9, %p1002_p2 }
  0x76   : > { %1012 = shalt.err (!%p1009_p1)
}
  0x77   : > { %201 = dma.hbm_to_vmem [thread:$0]  (%p786_p5), %s1341_s28, %s1330_s21, %s199_s30, %s1333_s0  }
  0x78 PF: > { %p788_p11 = scmp.ge.s32.totalorder %s1139_s19, 1  ;;  %p203_p4 = scmp.lt.s32.totalorder %s1139_s19, 5 }
  0x7a   : > { %p204_p6 = pnand %p788_p11, %p203_p4 }
  0x7b   : > { %s209_s22 = sand.u32 (!%p204_p6), 1, %s1115_s13   ;;  %p1641_p9 = scmp.ne.s32.totalorder (!%p204_p6), %s1636_s3, 0 }
  0x7c   : > { %207 = sbr.rel (%p204_p6) target bundleno = 467 (0x1d3), region = 28  ;;  %s789_s27 = sshll.u32 (!%p204_p6), %s209_s22, 5 }
  0x7d   : > { %s210_s26 = scalar_lea.sflag (!%p204_p6), [#allocation5], %s209_s22  ;;  %s1367_s20 = scalar_lea.vmem (!%p204_p6), [#allocation4], %s789_s27 }
  0x83   : > { %1086 = dma.done.wait (%p1641_p9), %s210_s26, 512  }
  0x84   : > { %1088 = vsyncadd (%p1641_p9), %s210_s26, 4294966784  ;;  %s790_s0 = sshll.u32 %s209_s22, 1  ;;  %s219_s21 = scalar_lea.sflag [#allocation8], %s209_s22 }
  0x85   : > { %s1373_s28 = scalar_lea.vmem [#allocation7], %s790_s0 }
  0x86   : > { %1090 = dma.done.wait (%p1641_p9), %s219_s21, 32  }
  0x87   : > { %1092 = vsyncadd (%p1641_p9), %s219_s21, 4294967264  ;;  %s245_s30 = sand.u32 1, %s1103_s10   ;;  %p792_p5 = scmp.ne.s32.totalorder %s1123_s15, 0 }
  0x88   : > { %s1382_s7 = sshll.u32 %s245_s30, 3  ;;  %v1145_v0 = vmov (!%p792_p5), 0.0  }
  0x89   : > { %s247_s24 = scalar_lea.vmem [#allocation9], %s1382_s7  ;;  %269 = sbr.rel (%p792_p5) target bundleno = 144 (0x90), region = 40  ;;  %270 = vst [vmem:[#allocation2] sm:$0x1] (!%p792_p5), %v1145_v0  ;;  %271 = vst [vmem:[#allocation3] sm:$0x1] (!%p792_p5), %v1145_v0 }
  0x90 PF: > { %v1387_v1 = vld [vmem:[%s1367_s20] sm:$0xff]  ;;  %v1390_v2 = vld [vmem:[%s1367_s20 + $0x8] sm:$0xff]  ;;  %v1409_v29 = vld [vmem:[%s1367_s20 + $0x10] sm:$0x1]  ;;  %s793_s3 = sshll.u32 %s1127_s16, 1  ;;  %vm588_vm13 = vcmask 1040384  }
  0x91   : > { %v299_v3 = vrot.slane %v1387_v1, 1  ;;  %v300_v4 = vrot.slane %v1390_v2, 1  ;;  %v305_v5 = vrot.slane %v1387_v1, 2  ;;  %v306_v6 = vrot.slane %v1390_v2, 2  ;;  %v1412_v30 = vld [vmem:[%s1367_s20 + $0x18] sm:$0x1]  ;;  %s1518_s25 = sadd.s32 %s1123_s15, %s793_s3 }
  0x92   : > { %v311_v9 = vrot.slane %v1387_v1, 3  ;;  %v312_v10 = vrot.slane %v1390_v2, 3  ;;  %v317_v13 = vrot.slane %v1387_v1, 4  ;;  %v318_v14 = vrot.slane %v1390_v2, 4  ;;  %v276_v60 = vld [vmem:[%s1373_s28] sm:$0x3] }
  0x93   : > { %v303_v7 = vmax.f32 %v1387_v1, %v299_v3  ;;  %v304_v8 = vmax.f32 %v1390_v2, %v300_v4  ;;  %v323_v17 = vrot.slane %v1387_v1, 5  ;;  %v324_v18 = vrot.slane %v1390_v2, 5  ;;  %p280_p8 = scmp.lt.s32.totalorder %s1518_s25, 2  ;;  %p291_p10 = scmp.lt.s32.totalorder %s1518_s25, 3 }
  0x94   : > { %v329_v21 = vrot.slane %v1387_v1, 6  ;;  %v330_v22 = vrot.slane %v1390_v2, 6  ;;  %v335_v25 = vrot.slane %v1387_v1, 7  ;;  %v336_v26 = vrot.slane %v1390_v2, 7  ;;  %p801_p12 = scmp.ne.s32.totalorder %s1123_s15, 1 }
  0x95   : > { %v309_v11 = vmax.f32 %v303_v7, %v305_v5  ;;  %v310_v12 = vmax.f32 %v304_v8, %v306_v6  ;;  %v1464_v5 = vunpack.c.0.s8 %v276_v60  ;;  %s281_s23 = scalar_select %p280_p8, %s1518_s25, 2 }
  0x96   : > { %s292_s4 = scalar_select %p291_p10, 1, 0 }
  0x97   : > { %v315_v15 = vmax.f32 %v309_v11, %v311_v9  ;;  %v316_v16 = vmax.f32 %v310_v12, %v312_v10  ;;  %vm371_vm0 = vcmp.eq.s32.totalorder %v1464_v5, 1  ;;  %vm398_vm1 = vcmp.eq.s32.totalorder %v1464_v5, 2  ;;  %s794_s6 = sshll.u32 %s281_s23, 8 }
  0x98   : > { %vm425_vm2 = vcmp.eq.s32.totalorder %v1464_v5, 3  ;;  %vm452_vm3 = vcmp.eq.s32.totalorder %v1464_v5, 4  ;;  %vm477_vm4 = vcmp.eq.s32.totalorder %v1464_v5, 5  ;;  %vm504_vm5 = vcmp.eq.s32.totalorder %v1464_v5, 6 }
  0x99   : > { %v321_v19 = vmax.f32 %v315_v15, %v317_v13  ;;  %v322_v20 = vmax.f32 %v316_v16, %v318_v14  ;;  %vm531_vm6 = vcmp.eq.s32.totalorder %v1464_v5, 7  ;;  %vm548_vm7 = vcmp.eq.s32.totalorder %v1464_v5, 8 }
  0x9b   : > { %v327_v23 = vmax.f32 %v321_v19, %v323_v17  ;;  %v328_v24 = vmax.f32 %v322_v20, %v324_v18 }
  0x9d   : > { %v333_v27 = vmax.f32 %v327_v23, %v329_v21  ;;  %v334_v28 = vmax.f32 %v328_v24, %v330_v22 }
  0x9f   : > { %v339_v31 = vmax.f32 %v333_v27, %v335_v25  ;;  %v340_v32 = vmax.f32 %v334_v28, %v336_v26 }
  0xa1   : > { %v1415_v33 = vmax.f32 %v339_v31, %v1409_v29  ;;  %v1418_v34 = vmax.f32 %v340_v32, %v1412_v30 }
  0xa3   : > { %v343_v35 = vsub.f32 %v1387_v1, %v1415_v33  ;;  %v344_v36 = vsub.f32 %v1390_v2, %v1418_v34  ;;  %v353_v37 = vrot.slane %v1415_v33, 7  ;;  %v354_v38 = vrot.slane %v1418_v34, 7 }
  0xa4   : > { %v380_v39 = vrot.slane %v1415_v33, 6  ;;  %v381_v40 = vrot.slane %v1418_v34, 6  ;;  %v407_v41 = vrot.slane %v1415_v33, 5  ;;  %v408_v42 = vrot.slane %v1418_v34, 5 }
  0xa5   : > { %v345_v43 = vmul.f32 1.442695, %v343_v35  ;;  %v347_v44 = vmul.f32 1.442695, %v344_v36  ;;  %v357_v45 = vsub.f32 %v1387_v1, %v353_v37  ;;  %v358_v46 = vsub.f32 %v1390_v2, %v354_v38 }
  0xa6   : > { %v1433_v47 = vsub.f32 %v1387_v1, %v380_v39  ;;  %v1436_v48 = vsub.f32 %v1390_v2, %v381_v40  ;;  %v1439_v49 = vsub.f32 %v1387_v1, %v407_v41  ;;  %v1442_v50 = vsub.f32 %v1390_v2, %v408_v42 }
  0xa7   : > { %917 = vpow2.f32 %v345_v43  ;;  %v359_v51 = vmul.f32 1.442695, %v357_v45  ;;  %v361_v52 = vmul.f32 1.442695, %v358_v46  ;;  %v434_v57 = vrot.slane %v1415_v33, 4 }
  0xa8   : > { %919 = vpow2.f32 %v347_v44  ;;  %v386_v53 = vmul.f32 1.442695, %v1433_v47  ;;  %v388_v54 = vmul.f32 1.442695, %v1436_v48  ;;  %v413_v55 = vmul.f32 1.442695, %v1439_v49 }
  0xa9   : > { %921 = vpow2.f32 %v359_v51  ;;  %v415_v56 = vmul.f32 1.442695, %v1442_v50  ;;  %v435_v58 = vrot.slane %v1418_v34, 4  ;;  %v459_v59 = vrot.slane %v1415_v33, 3 }
  0xaa   : > { %923 = vpow2.f32 %v361_v52  ;;  %v1453_v61 = vsub.f32 %v1387_v1, %v434_v57  ;;  %v460_v63 = vrot.slane %v1418_v34, 3  ;;  %v486_v4 = vrot.slane %v1415_v33, 2 }
  0xab   : > { %925 = vpow2.f32 %v386_v53  ;;  %v1456_v62 = vsub.f32 %v1390_v2, %v435_v58  ;;  %v1460_v0 = vsub.f32 %v1387_v1, %v459_v59  ;;  %v487_v9 = vrot.slane %v1418_v34, 2 }
  0xac   : > { %927 = vpow2.f32 %v388_v54  ;;  %v440_v3 = vmul.f32 1.442695, %v1453_v61  ;;  %v1468_v7 = vsub.f32 %v1390_v2, %v460_v63  ;;  %v1473_v10 = vsub.f32 %v1387_v1, %v486_v4 }
  0xad   : > { %929 = vpow2.f32 %v413_v55  ;;  %v442_v6 = vmul.f32 1.442695, %v1456_v62  ;;  %v465_v8 = vmul.f32 1.442695, %v1460_v0  ;;  %v513_v11 = vrot.slane %v1415_v33, 1 }
  0xae   : > { %931 = vpow2.f32 %v415_v56  ;;  %v374_v13 = vcombine.low %v357_v45, %v358_v46  ;;  %v467_v14 = vmul.f32 1.442695, %v1468_v7  ;;  %v1478_v16 = vsub.f32 %v1390_v2, %v487_v9 }
  0xaf   : > { %933 = vpow2.f32 %v440_v3  ;;  %v492_v17 = vmul.f32 1.442695, %v1473_v10  ;;  %v514_v18 = vrot.slane %v1418_v34, 1  ;;  %v1484_v20 = vsub.f32 %v1387_v1, %v513_v11 }
  0xb0   : > { %935 = vpow2.f32 %v442_v6  ;;  %v401_v23 = vcombine.low %v1433_v47, %v1436_v48  ;;  %v494_v24 = vmul.f32 1.442695, %v1478_v16  ;;  %v795_v27 = vrot.slane %v374_v13, 9 }
  0xb1   : > { %v918_v12 = vpop.eup %917  ;;  %937 = vpow2.f32 %v465_v8  ;;  %v1490_v28 = vsub.f32 %v1390_v2, %v514_v18  ;;  %v519_v31 = vmul.f32 1.442695, %v1484_v20  ;;  %v1495_v36 = vsub.f32 %v1409_v29, %v1415_v33 }
  0xb2   : > { %v920_v15 = vpop.eup %919  ;;  %939 = vpow2.f32 %v467_v14  ;;  %v796_v2 = vrot.slane %v401_v23, 10  ;;  %v428_v44 = vcombine.low %v1439_v49, %v1442_v50  ;;  %v1502_v29 = vsub.f32 %v1412_v30, %v1418_v34 }
  0xb3   : > { %v922_v19 = vpop.eup %921  ;;  %941 = vpow2.f32 %v492_v17  ;;  %v521_v40 = vmul.f32 1.442695, %v1490_v28  ;;  %v378_v47 = vsel %vm371_vm0, %v795_v27, 0.0  ;;  %v542_v51 = vmul.f32 1.442695, %v1495_v36 }
  0xb4   : > { %v924_v21 = vpop.eup %923  ;;  %v365_v22 = vrot.slane %v922_v19, 1  ;;  %943 = vpow2.f32 %v494_v24  ;;  %v1146_v53 = vmov 0.0   ;;  %v544_v55 = vmul.f32 1.442695, %v1502_v29 }
  0xb5   : > { %v926_v25 = vpop.eup %925  ;;  %v366_v26 = vrot.slane %v924_v21, 1  ;;  %945 = vpow2.f32 %v519_v31  ;;  %v379_v49 = vsel %vm371_vm0, 4.404879e-06, %v1146_v53  ;;  %v797_v34 = vrot.slane %v428_v44, 11 }
  0xb6   : > { %v928_v32 = vpop.eup %927  ;;  %v369_v35 = vadd.f32 %v918_v12, %v365_v22  ;;  %v392_v1 = vrot.slane %v926_v25, 2  ;;  %947 = vpow2.f32 %v521_v40  ;;  %v405_v58 = vsel %vm398_vm1, %v796_v2, %v378_v47 }
  0xb7   : > { %v930_v37 = vpop.eup %929  ;;  %v370_v38 = vadd.f32 %v920_v15, %v366_v26  ;;  %v393_v39 = vrot.slane %v928_v32, 2  ;;  %949 = vpow2.f32 %v542_v51  ;;  %v480_v6 = vcombine.high %v1460_v0, %v1468_v7 }
  0xb8   : > { %v932_v41 = vpop.eup %931  ;;  %v396_v42 = vadd.f32 %v392_v1, %v369_v35  ;;  %v419_v43 = vrot.slane %v930_v37, 3  ;;  %951 = vpow2.f32 %v544_v55  ;;  %v406_v8 = vsel %vm398_vm1, 8.2128776e-05, %v379_v49 }
  0xb9   : > { %v397_v45 = vadd.f32 %v393_v39, %v370_v38  ;;  %v420_v46 = vrot.slane %v932_v41, 3  ;;  %v934_v33 = vpop.eup %933  ;;  %v455_v9 = vcombine.high %v1453_v61, %v1456_v62  ;;  %v432_v14 = vsel %vm425_vm2, %v797_v34, %v405_v58 }
  0xba   : > { %v423_v48 = vadd.f32 %v419_v43, %v396_v42  ;;  %v936_v52 = vpop.eup %935  ;;  %v446_v54 = vrot.slane %v934_v33, 4  ;;  %v507_v18 = vcombine.high %v1473_v10, %v1478_v16  ;;  %v433_v61 = vsel %vm425_vm2, 3.8799844e-06, %v406_v8 }
  0xbb   : > { %v424_v50 = vadd.f32 %v420_v46, %v397_v45  ;;  %v938_v30 = vpop.eup %937  ;;  %v447_v56 = vrot.slane %v936_v52, 4  ;;  %v798_v62 = vrot.slane %v480_v6, 9  ;;  %v457_v22 = vsel %vm452_vm3, %v455_v9, %v432_v14 }
  0xbc   : > { %v940_v57 = vpop.eup %939  ;;  %v450_v59 = vadd.f32 %v446_v54, %v423_v48  ;;  %v471_v60 = vrot.slane %v938_v30, 5  ;;  %v534_v26 = vcombine.high %v1484_v20, %v1490_v28  ;;  %v458_v10 = vsel %vm452_vm3, 2.160994e-05, %v433_v61 }
  0xbd   : > { %v942_v63 = vpop.eup %941  ;;  %v451_v3 = vadd.f32 %v447_v56, %v424_v50  ;;  %v472_v4 = vrot.slane %v940_v57, 5  ;;  %v799_v16 = vrot.slane %v507_v18, 10  ;;  %v283_v31 = vlaneseq }
  0xbe   : > { %v475_v11 = vadd.f32 %v471_v60, %v450_v59  ;;  %v498_v12 = vrot.slane %v942_v63, 6  ;;  %v944_v13 = vpop.eup %943  ;;  %v484_v32 = vsel %vm477_vm4, %v798_v62, %v457_v22  ;;  %v485_v38 = vsel %vm477_vm4, 0.004716981, %v458_v10 }
  0xbf   : > { %v476_v15 = vadd.f32 %v472_v4, %v451_v3  ;;  %v946_v17 = vpop.eup %945  ;;  %v499_v0 = vrot.slane %v944_v13, 6  ;;  %v800_v39 = vrot.slane %v534_v26, 11  ;;  %v284_v41 = vand.u32 127, %v283_v31  ;;  %v572_v26 = vld [vmem:[#allocation2] sm:$0x1] }
  0xc0   : > { %v502_v7 = vadd.f32 %v498_v12, %v475_v11  ;;  %v525_v19 = vrot.slane %v946_v17, 7  ;;  %v948_v21 = vpop.eup %947  ;;  %v511_v20 = vsel %vm504_vm5, %v799_v16, %v484_v32  ;;  %v1545_v28 = vshrl.u32 %v283_v31, 7 }
  0xc1   : > { %v503_v23 = vadd.f32 %v499_v0, %v476_v15  ;;  %v526_v24 = vrot.slane %v948_v21, 7  ;;  %v950_v27 = vpop.eup %949  ;;  %v512_v42 = vsel %vm504_vm5, 2.447004e-06, %v485_v38  ;;  %v551_v2 = vcombine.low %v1495_v36, %v1502_v29 }
  0xc2   : > { %v529_v25 = vadd.f32 %v525_v19, %v502_v7  ;;  %v952_v1 = vpop.eup %951  ;;  %v538_v43 = vsel %vm531_vm6, %v800_v39, %v511_v20  ;;  %v285_v44 = vadd.s32 128, %v284_v41  ;;  %v286_v45 = vstv %s794_s6 }
  0xc3   : > { %v530_v35 = vadd.f32 %v526_v24, %v503_v23  ;;  %v539_v46 = vsel %vm531_vm6, 1.0233739e-05, %v512_v42  ;;  %v562_v33 = vsub.s32 0, %v1545_v28  ;;  %v553_v47 = vsel %vm548_vm7, %v551_v2, %v538_v43 }
  0xc4   : > { %v546_v37 = vadd.f32 %v950_v27, %v529_v25  ;;  %v566_v48 = vsub.s32 4, %v1545_v28  ;;  %v287_v51 = vadd.s32 %v286_v45, %v284_v41  ;;  %v288_v52 = vadd.s32 %v286_v45, %v285_v44  ;;  %v604_v27 = vld [vmem:[#allocation3] sm:$0x1] }
  0xc5   : > { %v547_v40 = vadd.f32 %v952_v1, %v530_v35  ;;  %v293_v53 = vstv %s292_s4  ;;  %v554_v49 = vsel %vm548_vm7, 7.4894024e-06, %v539_v46  ;;  %v563_v50 = vrot.slane %v553_v47, %v562_v33 }
  0xc6   : > { %953 = vlog2.f32 %v546_v37  ;;  %v567_v55 = vrot.slane %v553_v47, %v566_v48  ;;  %vm289_vm8 = vcmp.lt.s32.totalorder %v287_v51, 600  ;;  %vm294_vm9 = vcmp.eq.s32.totalorder %v293_v53, 1 }
  0xc7   : > { %955 = vlog2.f32 %v547_v40  ;;  %v577_v29 = vrot.slane %v554_v49, %v562_v33  ;;  %vm290_vm10 = vcmp.lt.s32.totalorder %v288_v52, 600  ;;  %v581_v34 = vrot.slane %v554_v49, %v566_v48  ;;  %vm295_vm11 = vmand %vm289_vm8, %vm294_vm9 }
  0xc8   : > { %vm296_vm12 = vmand %vm290_vm10, %vm294_vm9  ;;  %vm642_vm14 = vcmp.eq.s32.totalorder (!%p801_p12), %v1545_v28, 0  ;;  %vm643_vm15 = vcmp.eq.s32.totalorder (!%p801_p12), %v1545_v28, 1 }
  0xc9   : > { %v605_v60 = vsel %vm295_vm11, %v577_v29, 0.0  ;;  %v606_v63 = vsel %vm296_vm12, %v581_v34, 0.0 }
  0xca   : > { %v607_v9 = vsel %vm588_vm13, %v605_v60, 0.0  ;;  %v608_v11 = vsel %vm588_vm13, %v606_v63, 0.0 }
  0xcb   : > { %v609_v13 = vadd.f32 %v608_v11, %v607_v9 }
  0xd0   : > { %v954_v54 = vpop.eup %953 }
  0xd1   : > { %v956_v36 = vpop.eup %955  ;;  %v556_v5 = vmul.f32 0.6931472, %v954_v54 }
  0xd2   : > { %v558_v30 = vmul.f32 0.6931472, %v956_v36 }
  0xd3   : > { %v570_v56 = vsub.f32 %v556_v5, %v563_v50 }
  0xd4   : > { %v571_v57 = vsub.f32 %v558_v30, %v567_v55 }
  0xd5   : > { %v584_v58 = vmul.f32 %v577_v29, %v570_v56 }
  0xd6   : > { %v585_v59 = vmul.f32 %v581_v34, %v571_v57 }
  0xd7   : > { %v586_v3 = vsel %vm295_vm11, %v584_v58, 0.0 }
  0xd8   : > { %v587_v4 = vsel %vm296_vm12, %v585_v59, 0.0  ;;  %v589_v6 = vsel %vm588_vm13, %v586_v3, 0.0 }
  0xd9   : > { %v590_v8 = vsel %vm588_vm13, %v587_v4, 0.0 }
  0xda   : > { %v591_v12 = vadd.f32 %v590_v8, %v589_v6 }
  0xdc   : > { %592 = vadd.xlane.f32.xlu0 %v591_v12 }
  0xe0   : > { %610 = vadd.xlane.f32.xlu0 %v609_v13 }
 0x169   : > { %v593_v14 = vpop.xlane.xlu0 %592 }
 0x16a   : > { %v594_v15 = vrot.slane %v593_v14, 4 }
 0x16c   : > { %v595_v17 = vadd.f32 %v594_v15, %v593_v14 }
 0x16d   : > { %v611_v0 = vpop.xlane.xlu0 %610 }
 0x16e   : > { %v596_v7 = vrot.slane %v595_v17, 2  ;;  %v612_v18 = vrot.slane %v611_v0, 4 }
 0x170   : > { %v613_v61 = vadd.f32 %v612_v18, %v611_v0  ;;  %v597_v62 = vadd.f32 %v596_v7, %v595_v17 }
 0x172   : > { %v614_v19 = vrot.slane %v613_v61, 2  ;;  %v598_v21 = vrot.slane %v597_v62, 1 }
 0x174   : > { %v615_v22 = vadd.f32 %v614_v19, %v613_v61  ;;  %v599_v23 = vadd.f32 %v598_v21, %v597_v62 }
 0x176   : > { %812 = vpush %v599_v23  ;;  %v616_v24 = vrot.slane %v615_v22, 1 }
 0x178   : > { %v617_v25 = vadd.f32 %v616_v24, %v615_v22 }
 0x17a   : > { %814 = vpush %v617_v25 }
 0x1a7   : > { %s813_s17 = spop %812 }
 0x1a8   : > { %v601_v10 = vstv %s813_s17 }
 0x1a9   : > { %v602_v16 = vadd.f32 %v601_v10, %v572_v26  ;;  %625 = sbr.rel (%p801_p12) target bundleno = 442 (0x1ba), region = 44 }
 0x1ab   : > { %603 = vst [vmem:[#allocation2] sm:$0x1] %v602_v16  ;;  %s815_s29 = spop %814 }
 0x1ac   : > { %v619_v31 = vstv %s815_s29 }
 0x1ad   : > { %v620_v32 = vadd.f32 %v619_v31, %v604_v27 }
 0x1af   : > { %621 = vst [vmem:[#allocation3] sm:$0x1] %v620_v32 }
 0x1b2   : > { %v802_v35 = vld [vmem:[#allocation2] ss:$0 sm:$0xff] }
 0x1b6   : > { %v803_v1 = vld [vmem:[#allocation3] ss:$0 sm:$0xff] }
 0x1b7   : > { %v644_v37 = vsel %vm643_vm15, %v803_v1, 0.0 }
 0x1b8   : > { %v645_v38 = vsel %vm642_vm14, %v802_v35, %v644_v37 }
 0x1b9   : > { %646 = vst [vmem:[%s247_s24] sm:$0xff] %v645_v38 }
 0x1ba PF: > { %s805_s18 = sshll.u32 %s1127_s16, 7  ;;  %s661_s26 = sshll.u32 %s247_s24, 4  ;;  %s662_s26 = int_to_ptr.vmem [resolvable:$true] %s661_s26 }
 0x1bb   : > { %s1561_s27 = scalar_lea.hbm %s1623_s2, %s805_s18  ;;  %s648_s20 = scalar_lea.sflag [#allocation6], %s245_s30 }
 0x1bc   : > { %s1013_s0 = scalar_lea.vmem %s662_s26, 128  ;;  %p1642_p0 = scmp.ne.s32.totalorder %s1638_s8, 0 }
 0x1bd   : > { %p1014_p13 = scmp.ne.s32.totalorder %s662_s26, %s1013_s0  ;;  %s1147_s21 = smov [#allocation9]  }
 0x1be   : > { %s1017_s28 = sshll.u32 %s1147_s21, 4  ;;  %s1018_s28 = int_to_ptr.vmem [resolvable:$false] %s1017_s28 }
 0x1bf   : > { %p1015_p2 = pnand %p1014_p13, %p1642_p0  ;;  %s1019_s3 = scalar_lea.vmem %s1018_s28, 256 }
 0x1c0   : > { %p1020_p7 = scmp.lt.s32.totalorder %s662_s26, %s1018_s28  ;;  %p1021_p1 = scmp.lt.s32.totalorder %s1019_s3, %s1013_s0 }
 0x1c1   : > { %p1016_p3 = pneg %p1015_p2 }
 0x1c2   : > { %p1022_p11 = por %p1021_p1, %p1020_p7 }
 0x1c4   : > { %p1023_p4 = pnand %p1022_p11, %p1016_p3 }
 0x1c6   : > { %1026 = shalt.err (!%p1023_p4)
}
 0x1c7   : > { %s1027_s16 = scalar_lea.hbm %s1561_s27, 128  ;;  %s1031_s24 = scalar_lea.hbm %s1623_s2, 256 }
 0x1c8   : > { %p1028_p6 = scmp.ne.s32.totalorder %s1561_s27, %s1027_s16  ;;  %p1032_p8 = scmp.lt.u32.totalorder %s1561_s27, %s1623_s2 }
 0x1c9   : > { %p1033_p10 = scmp.lt.u32.totalorder %s1031_s24, %s1027_s16  ;;  %p1035_p13 = scmp.lt.u32.totalorder %s1027_s16, %s1561_s27 }
 0x1ca   : > { %p1029_p9 = pnand %p1028_p6, %p1642_p0 }
 0x1cb   : > { %p1034_p12 = por %p1033_p10, %p1032_p8 }
 0x1cc   : > { %p1030_p5 = pneg %p1029_p9 }
 0x1cd   : > { %p1036_p2 = por %p1035_p13, %p1034_p12 }
 0x1cf   : > { %p1037_p3 = pnand %p1036_p2, %p1030_p5 }
 0x1d1   : > { %1040 = shalt.err (!%p1037_p3)
}
 0x1d2   : > { %818 = dma.vmem_to_hbm [thread:$0]  (%p1642_p0), %s662_s26, 128, %s1561_s27, %s648_s20  }
 0x1d3 PF: > { %p824_p7 = scmp.ge.s32.totalorder %s1139_s19, 2  ;;  %s673_s6 = sand.u32 1, %s1099_s9  }
 0x1d4   : > { %p1643_p1 = scmp.ne.s32.totalorder %s1639_s12, 0  ;;  %s674_s4 = scalar_lea.sflag [#allocation6], %s673_s6 }
 0x1d6   : > { %p821_p11 = pnand %p824_p7, %p1643_p1 }
 0x1d8   : > { %1094 = dma.done.wait (!%p821_p11), %s674_s4, 128  }
 0x1d9   : > { %1096 = vsyncadd (!%p821_p11), %s674_s4, 4294967168  ;;  %s21_s19 = sadd.s32 1, %s1139_s19   ;;  %s1644_s8 = sld [smem:[#allocation17_spill]] }
 0x1da   : > { %p18_p4 = scmp.ge.s32.totalorder %s21_s19, 6   ;;  %s1645_s15 = sld [smem:[#allocation13_spill]] }
 0x1db   : > { %s1646_s16 = sld [smem:[#allocation14_spill]]  ;;  %s1647_s17 = sld [smem:[#allocation15_spill]] }
 0x1dc   : > { %s1648_s18 = sld [smem:[#allocation16_spill]]  ;;  %s1649_s9 = smov %s1103_s10 }
 0x1dd   : > { %s1650_s10 = smov %s1107_s11  ;;  %s1651_s11 = smov %s1253_s5 }
 0x1de   : > { %s1652_s12 = smov %s1115_s13  ;;  %s1653_s13 = smov %s1119_s14 }
 0x1df   : > { %s1654_s14 = smov %s1644_s8  ;;  %20 = sbr.rel (!%p18_p4) target bundleno = 13 (0xd), region = 94 }
 0x1e6   :  { %679 = vsyncpa [#allocation5], 1 }
 0x1e7   :  { %681 = vsyncpa [#allocation5 + $0x1], 1 }
 0x1e8   :  { %682 = vsyncpa [#allocation8], 1 }
 0x1e9   :  { %684 = vsyncpa [#allocation8 + $0x1], 1 }
 0x1ea   :  { %685 = vsyncpa [#allocation6], 1 }
 0x1eb   :  { %687 = vsyncpa [#allocation6 + $0x1], 1 }

</bundles_post_ra>
